<compile_context>
chip_gen: v7x
topology: tpu7x:2x2x1
jax: 0.10.0
libtpu: 0.0.40
codegen_flags: <defaults>
</compile_context>

<pallas_src>
import functools
import math

import jax
import jax.numpy as jnp
from jax.experimental import pallas as pl
from jax.experimental.pallas import tpu as pltpu

ALPHA = 0.3
BETA = 0.7
SMOOTH = 1.0
GAMMA = 0.75


def _pow2_ceil(n):
    n = max(1, int(n))
    return 1 << (n - 1).bit_length()


def _pow2_floor(n):
    n = max(1, int(n))
    return 1 << (n.bit_length() - 1)


def _num_tensorcores():
    # v7x packs 2 TensorCores per chip; v5e/v6e have 1.
    # TODO(synk): switch to an official core-count query when exposed via pltpu.get_tpu_info.
    try:
        kind = (jax.devices()[0].device_kind or "").lower()
    except Exception:
        return 1
    return 2 if "v7" in kind else 1


def _focal_tversky_partial_kernel(S_total, net_ref, lab_ref,
                                  sum_p_ref, sum_y_ref, sum_py_ref,
                                  acc_p_ref, acc_y_ref, acc_py_ref):
    pi = pl.program_id(0)
    ti = pl.program_id(1)
    n_t = pl.num_programs(1)

    @pl.when(ti == 0)
    def _init():
        acc_p_ref[...] = jnp.zeros_like(acc_p_ref)
        acc_y_ref[...] = jnp.zeros_like(acc_y_ref)
        acc_py_ref[...] = jnp.zeros_like(acc_py_ref)

    x = net_ref[...].astype(jnp.float32)           # (B, C, TS) logits
    labels = lab_ref[...]                          # (B, TS) int32
    B, C, TS = x.shape

    # Positional validity mask for the ragged tail (no wrapper-side padding): the
    # out-of-bounds lanes of a boundary block contain garbage, so the logits MUST be
    # masked before max/exp/sum (NaN/Inf would otherwise propagate).
    base = (pi * n_t + ti) * TS                    # global lane offset of this tile
    lane = jax.lax.broadcasted_iota(jnp.int32, (B, TS), 1)
    pos = (lane + base) < S_total                  # (B, TS) bool
    pos3 = pos[:, None, :]                         # (B, 1, TS)

    x = jnp.where(pos3, x, 0.0)
    lab = jnp.where(pos, labels, -1)               # garbage labels can never match

    # One-hot target rebuilt in-kernel (never materialized in HBM).
    ch = jax.lax.broadcasted_iota(jnp.int32, (B, C, TS), 1)
    y = (ch == lab[:, None, :]).astype(jnp.float32)

    # Channel softmax, numerically stabilized; reciprocal goes to the EUP slot.
    x_max = jnp.max(x, axis=1, keepdims=True)
    e = jnp.exp(x - x_max)
    denom = jnp.sum(e, axis=1, keepdims=True)
    p = e * pl.reciprocal(denom, approx=False)
    p = jnp.where(pos3, p, 0.0)                    # zero the padded columns

    # Lanewise tree-fold down to 128 lanes: pure VPU adds on lane-aligned static slices
    # (TS/128 is a power of two by construction), no cross-lane XLU work per tile.
    def _fold_to_128(a):
        while a.shape[-1] > 128:
            h = a.shape[-1] // 2
            a = a[..., :h] + a[..., h:]
        return a

    acc_p_ref[...] = acc_p_ref[...] + _fold_to_128(p)
    acc_y_ref[...] = acc_y_ref[...] + _fold_to_128(y)
    acc_py_ref[...] = acc_py_ref[...] + _fold_to_128(p * y)

    # Single cross-lane reduce + single store per output, once per slice.
    @pl.when(ti == n_t - 1)
    def _finalize():
        sum_p_ref[...] = jnp.sum(acc_p_ref[...], axis=-1)[None]
        sum_y_ref[...] = jnp.sum(acc_y_ref[...], axis=-1)[None]
        sum_py_ref[...] = jnp.sum(acc_py_ref[...], axis=-1)[None]


def focal_tversky_loss(net_output, target, *,
                       alpha=ALPHA, beta=BETA, smooth=SMOOTH, gamma=GAMMA,
                       do_bg=True, batch_dice=False,
                       tile_s=32768, num_slices=None):
    """net_output: (B, C, *spatial) logits; target: (B, *spatial) or (B, 1, *spatial)
    int label map, or a (B, C, *spatial) exact one-hot encoding."""
    B, C = net_output.shape[:2]
    S = math.prod(net_output.shape[2:])

    # Stream the logits as-is (no wrapper-side pad, no standalone dtype-cast pass);
    # the kernel upcasts to f32 and masks the ragged tail itself.
    net_flat = net_output.reshape(B, C, S)

    if target.ndim == net_output.ndim and target.shape[1] == C and C > 1:
        # TODO(synk): soft (non-exact) one-hot targets are collapsed to hard labels here.
        labels = jnp.argmax(target, axis=1).reshape(B, S)
    else:
        labels = target.reshape(B, S)
    labels = labels.astype(jnp.int32)

    # --- tiling: P slices (one per TensorCore) x large power-of-two lane tiles ---
    P = _num_tensorcores() if num_slices is None else max(1, int(num_slices))
    groups_total = -(-S // 128)                     # number of 128-lane groups
    P = max(1, min(P, groups_total))
    per_groups = -(-groups_total // P)              # 128-groups per slice (ceil)
    cap_groups = _pow2_floor(max(1, tile_s // 128))
    groups = min(cap_groups, _pow2_ceil(per_groups))  # power of two -> clean tree fold
    tile = groups * 128
    tiles_per_slice = -(-per_groups // groups)
    grid = (P, tiles_per_slice)
    nblk = -(-groups_total // groups)               # number of real lane blocks

    def _logits_idx(pi, ti):
        b = jnp.minimum(pi * tiles_per_slice + ti, nblk - 1)  # clamp: never a fully-OOB DMA
        return (0, 0, b)

    def _labels_idx(pi, ti):
        b = jnp.minimum(pi * tiles_per_slice + ti, nblk - 1)
        return (0, b)

    kernel = functools.partial(_focal_tversky_partial_kernel, S)

    bytes_accessed = (B * C * S * net_flat.dtype.itemsize + B * S * 4
                      + 3 * P * B * C * 4)
    cost = pl.CostEstimate(flops=10 * B * C * S,
                           transcendentals=B * C * S,
                           bytes_accessed=bytes_accessed)

    partials = pl.pallas_call(
        kernel,
        out_shape=(jax.ShapeDtypeStruct((P, B, C), jnp.float32),   # sum softmax(x)
                   jax.ShapeDtypeStruct((P, B, C), jnp.float32),   # sum y_onehot
                   jax.ShapeDtypeStruct((P, B, C), jnp.float32)),  # sum softmax(x)*y
        grid_spec=pltpu.PrefetchScalarGridSpec(
            num_scalar_prefetch=0,
            grid=grid,
            in_specs=[
                pl.BlockSpec((B, C, tile), _logits_idx),
                pl.BlockSpec((B, tile), _labels_idx),
            ],
            out_specs=[
                pl.BlockSpec((1, B, C), lambda pi, ti: (pi, 0, 0)),
                pl.BlockSpec((1, B, C), lambda pi, ti: (pi, 0, 0)),
                pl.BlockSpec((1, B, C), lambda pi, ti: (pi, 0, 0)),
            ],
            scratch_shapes=[pltpu.VMEM((B, C, 128), jnp.float32),
                            pltpu.VMEM((B, C, 128), jnp.float32),
                            pltpu.VMEM((B, C, 128), jnp.float32)],
        ),
        compiler_params=pltpu.CompilerParams(
            dimension_semantics=("parallel", "arbitrary"),
            vmem_limit_bytes=48 * 1024 * 1024),
        cost_estimate=cost,
    )(net_flat, labels)

    # --- tiny scalar epilogue in plain JAX (combines per-slice partials) ---
    sum_p, sum_y, sum_py = (x.sum(axis=0) for x in partials)   # each (B, C)
    tp = sum_py
    fp = sum_p - sum_py
    fn = sum_y - sum_py
    if batch_dice:
        tp, fp, fn = tp.sum(axis=0), fp.sum(axis=0), fn.sum(axis=0)
    tversky = (tp + smooth) / (tp + alpha * fp + beta * fn + smooth)
    if not do_bg:
        tversky = tversky[1:] if batch_dice else tversky[:, 1:]
    tversky_loss = -jnp.mean(tversky)            # TverskyLoss.forward
    return (1.0 + tversky_loss) ** gamma         # FocalTversky_loss.forward


def focal_tversky_loss_ref(net_output, target, *,
                           alpha=ALPHA, beta=BETA, smooth=SMOOTH, gamma=GAMMA,
                           do_bg=True, batch_dice=False):
    """Pure-JAX reference mirroring the PyTorch module."""
    B, C = net_output.shape[:2]
    S = math.prod(net_output.shape[2:])
    x = jax.nn.softmax(net_output.reshape(B, C, S).astype(jnp.float32), axis=1)
    labels = target.reshape(B, S).astype(jnp.int32)
    y = (labels[:, None, :] == jnp.arange(C, dtype=jnp.int32)[None, :, None]
         ).astype(jnp.float32)
    tp = jnp.sum(x * y, axis=-1)
    fp = jnp.sum(x * (1.0 - y), axis=-1)
    fn = jnp.sum((1.0 - x) * y, axis=-1)
    if batch_dice:
        tp, fp, fn = tp.sum(0), fp.sum(0), fn.sum(0)
    tversky = (tp + smooth) / (tp + alpha * fp + beta * fn + smooth)
    if not do_bg:
        tversky = tversky[1:] if batch_dice else tversky[:, 1:]
    return (1.0 - jnp.mean(tversky)) ** gamma


if __name__ == "__main__":
    key = jax.random.PRNGKey(0)
    k1, k2, k3, k4 = jax.random.split(key, 4)

    # --- test 1: 128-aligned spatial size ---
    B, C, X, Y, Z = 2, 4, 8, 8, 8
    net_output = jax.random.normal(k1, (B, C, X, Y, Z), dtype=jnp.float32)
    target = jax.random.randint(k2, (B, X, Y, Z), 0, C, dtype=jnp.int32)
    loss = jax.block_until_ready(focal_tversky_loss(net_output, target))
    ref = focal_tversky_loss_ref(net_output, target)
    assert jnp.allclose(loss, ref, atol=1e-5, rtol=1e-5), (loss, ref)

    # --- test 2: ragged spatial size (exercises the in-kernel positional mask) ---
    B2, C2, X2, Y2, Z2 = 2, 4, 7, 9, 5          # S = 315, not a multiple of 128
    net_output2 = jax.random.normal(k3, (B2, C2, X2, Y2, Z2), dtype=jnp.float32)
    target2 = jax.random.randint(k4, (B2, X2, Y2, Z2), 0, C2, dtype=jnp.int32)
    loss2 = jax.block_until_ready(focal_tversky_loss(net_output2, target2))
    ref2 = focal_tversky_loss_ref(net_output2, target2)
    assert jnp.allclose(loss2, ref2, atol=1e-5, rtol=1e-5), (loss2, ref2)

    # --- test 3: force the 2-slice "parallel" path (v7x layout) on any chip ---
    loss3 = jax.block_until_ready(
        focal_tversky_loss(net_output2, target2, num_slices=2))
    assert jnp.allclose(loss3, ref2, atol=1e-5, rtol=1e-5), (loss3, ref2)

    print("KERNEL_OK")
</pallas_src>

<mosaic_0001>
module attributes {stable_mosaic.version = 11 : i64} {
  func.func @_focal_tversky_partial_kernel(%arg0: i32, %arg1: i32, %arg2: memref<2x4x512xf32, #tpu.memory_space<vmem>>, %arg3: memref<2x512xi32, #tpu.memory_space<vmem>>, %arg4: memref<1x2x4xf32, #tpu.memory_space<vmem>>, %arg5: memref<1x2x4xf32, #tpu.memory_space<vmem>>, %arg6: memref<1x2x4xf32, #tpu.memory_space<vmem>>, %arg7: memref<2x4x128xf32, #tpu.memory_space<vmem>>, %arg8: memref<2x4x128xf32, #tpu.memory_space<vmem>>, %arg9: memref<2x4x128xf32, #tpu.memory_space<vmem>>) attributes {dimension_semantics = [#tpu.dimension_semantics<parallel>, #tpu.dimension_semantics<arbitrary>], iteration_bounds = array<i64: 1, 1>, scalar_prefetch = 0 : i64, scratch_operands = 3 : i64, tpu.core_type = #tpu.core_type<tc>, window_params = [{transform_indices = @transform_0, window_bounds = array<i64: 2, 4, 512>}, {transform_indices = @transform_1, window_bounds = array<i64: 2, 512>}, {transform_indices = @transform_2, window_bounds = array<i64: 1, 2, 4>}, {transform_indices = @transform_3, window_bounds = array<i64: 1, 2, 4>}, {transform_indices = @transform_4, window_bounds = array<i64: 1, 2, 4>}]} {
    %c0_i32 = arith.constant 0 : i32
    %0 = arith.cmpi eq, %arg1, %c0_i32 : i32
    %1 = arith.extui %0 : i1 to i32
    %c0_i32_0 = arith.constant 0 : i32
    %2 = arith.cmpi ne, %1, %c0_i32_0 : i32
    scf.if %2 {
      %cst_29 = arith.constant 0.000000e+00 : f32
      %71 = vector.broadcast %cst_29 : f32 to vector<2x4x128xf32>
      %c0_30 = arith.constant 0 : index
      %c0_31 = arith.constant 0 : index
      %c0_32 = arith.constant 0 : index
      %72 = vector.load %arg7[%c0_30, %c0_31, %c0_32] : memref<2x4x128xf32, #tpu.memory_space<vmem>>, vector<2x4x128xf32>
      tpu.vector_store %arg7[%c0_30, %c0_31, %c0_32], %71 {strides = array<i32>} : memref<2x4x128xf32, #tpu.memory_space<vmem>>, vector<2x4x128xf32>,
      %cst_33 = arith.constant 0.000000e+00 : f32
      %73 = vector.broadcast %cst_33 : f32 to vector<2x4x128xf32>
      %c0_34 = arith.constant 0 : index
      %c0_35 = arith.constant 0 : index
      %c0_36 = arith.constant 0 : index
      %74 = vector.load %arg8[%c0_34, %c0_35, %c0_36] : memref<2x4x128xf32, #tpu.memory_space<vmem>>, vector<2x4x128xf32>
      tpu.vector_store %arg8[%c0_34, %c0_35, %c0_36], %73 {strides = array<i32>} : memref<2x4x128xf32, #tpu.memory_space<vmem>>, vector<2x4x128xf32>,
      %cst_37 = arith.constant 0.000000e+00 : f32
      %75 = vector.broadcast %cst_37 : f32 to vector<2x4x128xf32>
      %c0_38 = arith.constant 0 : index
      %c0_39 = arith.constant 0 : index
      %c0_40 = arith.constant 0 : index
      %76 = vector.load %arg9[%c0_38, %c0_39, %c0_40] : memref<2x4x128xf32, #tpu.memory_space<vmem>>, vector<2x4x128xf32>
      tpu.vector_store %arg9[%c0_38, %c0_39, %c0_40], %75 {strides = array<i32>} : memref<2x4x128xf32, #tpu.memory_space<vmem>>, vector<2x4x128xf32>,
    } else {
    }
    %c0 = arith.constant 0 : index
    %c0_1 = arith.constant 0 : index
    %c0_2 = arith.constant 0 : index
    %3 = vector.load %arg2[%c0, %c0_1, %c0_2] : memref<2x4x512xf32, #tpu.memory_space<vmem>>, vector<2x4x512xf32>
    %c0_3 = arith.constant 0 : index
    %c0_4 = arith.constant 0 : index
    %4 = vector.load %arg3[%c0_3, %c0_4] : memref<2x512xi32, #tpu.memory_space<vmem>>, vector<2x512xi32>
    %c1_i32 = arith.constant 1 : i32
    %5 = arith.muli %arg0, %c1_i32 : i32
    %6 = arith.addi %5, %arg1 : i32
    %c512_i32 = arith.constant 512 : i32
    %7 = arith.muli %6, %c512_i32 : i32
    %8 = tpu.iota {dimensions = array<i32: 1>} : vector<2x512xi32>
    %9 = vector.broadcast %7 : i32 to vector<2x512xi32>
    %10 = arith.addi %8, %9 : vector<2x512xi32>
    %c512_i32_5 = arith.constant 512 : i32
    %11 = vector.broadcast %c512_i32_5 : i32 to vector<2x512xi32>
    %12 = arith.cmpi slt, %10, %11 : vector<2x512xi32>
    %13 = vector.shape_cast %12 : vector<2x512xi1> to vector<2x1x512xi1>
    %cst = arith.constant 0.000000e+00 : f32
    %14 = vector.shape_cast %13 : vector<2x1x512xi1> to vector<2x1x512xi1>
    %15 = vector.broadcast %14 : vector<2x1x512xi1> to vector<2x4x512xi1>
    %16 = vector.broadcast %cst : f32 to vector<2x4x512xf32>
    %17 = arith.select %15, %3, %16 : vector<2x4x512xi1>, vector<2x4x512xf32>
    %c-1_i32 = arith.constant -1 : i32
    %18 = vector.broadcast %c-1_i32 : i32 to vector<2x512xi32>
    %19 = arith.select %12, %4, %18 : vector<2x512xi1>, vector<2x512xi32>
    %20 = tpu.iota {dimensions = array<i32: 1>} : vector<2x4x512xi32>
    %21 = vector.shape_cast %19 : vector<2x512xi32> to vector<2x1x512xi32>
    %22 = vector.broadcast %21 : vector<2x1x512xi32> to vector<2x4x512xi32>
    %23 = arith.cmpi eq, %20, %22 : vector<2x4x512xi32>
    %24 = arith.extui %23 : vector<2x4x512xi1> to vector<2x4x512xi32>
    %25 = arith.sitofp %24 : vector<2x4x512xi32> to vector<2x4x512xf32>
    %cst_6 = arith.constant dense<0xFF800000> : vector<2x512xf32>
    %26 = vector.multi_reduction <maximumf>, %17, %cst_6 [1] : vector<2x4x512xf32> to vector<2x512xf32>
    %27 = vector.shape_cast %26 : vector<2x512xf32> to vector<2x1x512xf32>
    %28 = vector.broadcast %27 : vector<2x1x512xf32> to vector<2x4x512xf32>
    %29 = arith.subf %17, %28 : vector<2x4x512xf32>
    %30 = math.exp %29 : vector<2x4x512xf32>
    %cst_7 = arith.constant dense<0.000000e+00> : vector<2x512xf32>
    %31 = vector.multi_reduction <add>, %30, %cst_7 [1] : vector<2x4x512xf32> to vector<2x512xf32>
    %32 = vector.shape_cast %31 : vector<2x512xf32> to vector<2x1x512xf32>
    %33 = tpu.reciprocal %32 : vector<2x1x512xf32> -> vector<2x1x512xf32>
    %34 = vector.broadcast %33 : vector<2x1x512xf32> to vector<2x4x512xf32>
    %35 = arith.mulf %30, %34 : vector<2x4x512xf32>
    %cst_8 = arith.constant 0.000000e+00 : f32
    %36 = vector.shape_cast %13 : vector<2x1x512xi1> to vector<2x1x512xi1>
    %37 = vector.broadcast %36 : vector<2x1x512xi1> to vector<2x4x512xi1>
    %38 = vector.broadcast %cst_8 : f32 to vector<2x4x512xf32>
    %39 = arith.select %37, %35, %38 : vector<2x4x512xi1>, vector<2x4x512xf32>
    %c0_9 = arith.constant 0 : index
    %c0_10 = arith.constant 0 : index
    %c0_11 = arith.constant 0 : index
    %40 = vector.load %arg7[%c0_9, %c0_10, %c0_11] : memref<2x4x128xf32, #tpu.memory_space<vmem>>, vector<2x4x128xf32>
    %41 = vector.extract_strided_slice %39 {offsets = [0, 0, 0], sizes = [2, 4, 256], strides = [1, 1, 1]} : vector<2x4x512xf32> to vector<2x4x256xf32>
    %42 = vector.extract_strided_slice %39 {offsets = [0, 0, 256], sizes = [2, 4, 256], strides = [1, 1, 1]} : vector<2x4x512xf32> to vector<2x4x256xf32>
    %43 = arith.addf %41, %42 : vector<2x4x256xf32>
    %44 = vector.extract_strided_slice %43 {offsets = [0, 0, 0], sizes = [2, 4, 128], strides = [1, 1, 1]} : vector<2x4x256xf32> to vector<2x4x128xf32>
    %45 = vector.extract_strided_slice %43 {offsets = [0, 0, 128], sizes = [2, 4, 128], strides = [1, 1, 1]} : vector<2x4x256xf32> to vector<2x4x128xf32>
    %46 = arith.addf %44, %45 : vector<2x4x128xf32>
    %47 = arith.addf %40, %46 : vector<2x4x128xf32>
    %c0_12 = arith.constant 0 : index
    %c0_13 = arith.constant 0 : index
    %c0_14 = arith.constant 0 : index
    %48 = vector.load %arg7[%c0_12, %c0_13, %c0_14] : memref<2x4x128xf32, #tpu.memory_space<vmem>>, vector<2x4x128xf32>
    tpu.vector_store %arg7[%c0_12, %c0_13, %c0_14], %47 {strides = array<i32>} : memref<2x4x128xf32, #tpu.memory_space<vmem>>, vector<2x4x128xf32>,
    %c0_15 = arith.constant 0 : index
    %c0_16 = arith.constant 0 : index
    %c0_17 = arith.constant 0 : index
    %49 = vector.load %arg8[%c0_15, %c0_16, %c0_17] : memref<2x4x128xf32, #tpu.memory_space<vmem>>, vector<2x4x128xf32>
    %50 = vector.extract_strided_slice %25 {offsets = [0, 0, 0], sizes = [2, 4, 256], strides = [1, 1, 1]} : vector<2x4x512xf32> to vector<2x4x256xf32>
    %51 = vector.extract_strided_slice %25 {offsets = [0, 0, 256], sizes = [2, 4, 256], strides = [1, 1, 1]} : vector<2x4x512xf32> to vector<2x4x256xf32>
    %52 = arith.addf %50, %51 : vector<2x4x256xf32>
    %53 = vector.extract_strided_slice %52 {offsets = [0, 0, 0], sizes = [2, 4, 128], strides = [1, 1, 1]} : vector<2x4x256xf32> to vector<2x4x128xf32>
    %54 = vector.extract_strided_slice %52 {offsets = [0, 0, 128], sizes = [2, 4, 128], strides = [1, 1, 1]} : vector<2x4x256xf32> to vector<2x4x128xf32>
    %55 = arith.addf %53, %54 : vector<2x4x128xf32>
    %56 = arith.addf %49, %55 : vector<2x4x128xf32>
    %c0_18 = arith.constant 0 : index
    %c0_19 = arith.constant 0 : index
    %c0_20 = arith.constant 0 : index
    %57 = vector.load %arg8[%c0_18, %c0_19, %c0_20] : memref<2x4x128xf32, #tpu.memory_space<vmem>>, vector<2x4x128xf32>
    tpu.vector_store %arg8[%c0_18, %c0_19, %c0_20], %56 {strides = array<i32>} : memref<2x4x128xf32, #tpu.memory_space<vmem>>, vector<2x4x128xf32>,
    %c0_21 = arith.constant 0 : index
    %c0_22 = arith.constant 0 : index
    %c0_23 = arith.constant 0 : index
    %58 = vector.load %arg9[%c0_21, %c0_22, %c0_23] : memref<2x4x128xf32, #tpu.memory_space<vmem>>, vector<2x4x128xf32>
    %59 = arith.mulf %39, %25 : vector<2x4x512xf32>
    %60 = vector.extract_strided_slice %59 {offsets = [0, 0, 0], sizes = [2, 4, 256], strides = [1, 1, 1]} : vector<2x4x512xf32> to vector<2x4x256xf32>
    %61 = vector.extract_strided_slice %59 {offsets = [0, 0, 256], sizes = [2, 4, 256], strides = [1, 1, 1]} : vector<2x4x512xf32> to vector<2x4x256xf32>
    %62 = arith.addf %60, %61 : vector<2x4x256xf32>
    %63 = vector.extract_strided_slice %62 {offsets = [0, 0, 0], sizes = [2, 4, 128], strides = [1, 1, 1]} : vector<2x4x256xf32> to vector<2x4x128xf32>
    %64 = vector.extract_strided_slice %62 {offsets = [0, 0, 128], sizes = [2, 4, 128], strides = [1, 1, 1]} : vector<2x4x256xf32> to vector<2x4x128xf32>
    %65 = arith.addf %63, %64 : vector<2x4x128xf32>
    %66 = arith.addf %58, %65 : vector<2x4x128xf32>
    %c0_24 = arith.constant 0 : index
    %c0_25 = arith.constant 0 : index
    %c0_26 = arith.constant 0 : index
    %67 = vector.load %arg9[%c0_24, %c0_25, %c0_26] : memref<2x4x128xf32, #tpu.memory_space<vmem>>, vector<2x4x128xf32>
    tpu.vector_store %arg9[%c0_24, %c0_25, %c0_26], %66 {strides = array<i32>} : memref<2x4x128xf32, #tpu.memory_space<vmem>>, vector<2x4x128xf32>,
    %c0_i32_27 = arith.constant 0 : i32
    %68 = arith.cmpi eq, %arg1, %c0_i32_27 : i32
    %69 = arith.extui %68 : i1 to i32
    %c0_i32_28 = arith.constant 0 : i32
    %70 = arith.cmpi ne, %69, %c0_i32_28 : i32
    scf.if %70 {
      %c0_29 = arith.constant 0 : index
      %c0_30 = arith.constant 0 : index
      %c0_31 = arith.constant 0 : index
      %71 = vector.load %arg7[%c0_29, %c0_30, %c0_31] : memref<2x4x128xf32, #tpu.memory_space<vmem>>, vector<2x4x128xf32>
      %cst_32 = arith.constant dense<0.000000e+00> : vector<2x4xf32>
      %72 = vector.multi_reduction <add>, %71, %cst_32 [2] : vector<2x4x128xf32> to vector<2x4xf32>
      %73 = vector.shape_cast %72 : vector<2x4xf32> to vector<1x2x4xf32>
      %c0_33 = arith.constant 0 : index
      %c0_34 = arith.constant 0 : index
      %c0_35 = arith.constant 0 : index
      %74 = vector.load %arg4[%c0_33, %c0_34, %c0_35] : memref<1x2x4xf32, #tpu.memory_space<vmem>>, vector<1x2x4xf32>
      tpu.vector_store %arg4[%c0_33, %c0_34, %c0_35], %73 {strides = array<i32>} : memref<1x2x4xf32, #tpu.memory_space<vmem>>, vector<1x2x4xf32>,
      %c0_36 = arith.constant 0 : index
      %c0_37 = arith.constant 0 : index
      %c0_38 = arith.constant 0 : index
      %75 = vector.load %arg8[%c0_36, %c0_37, %c0_38] : memref<2x4x128xf32, #tpu.memory_space<vmem>>, vector<2x4x128xf32>
      %cst_39 = arith.constant dense<0.000000e+00> : vector<2x4xf32>
      %76 = vector.multi_reduction <add>, %75, %cst_39 [2] : vector<2x4x128xf32> to vector<2x4xf32>
      %77 = vector.shape_cast %76 : vector<2x4xf32> to vector<1x2x4xf32>
      %c0_40 = arith.constant 0 : index
      %c0_41 = arith.constant 0 : index
      %c0_42 = arith.constant 0 : index
      %78 = vector.load %arg5[%c0_40, %c0_41, %c0_42] : memref<1x2x4xf32, #tpu.memory_space<vmem>>, vector<1x2x4xf32>
      tpu.vector_store %arg5[%c0_40, %c0_41, %c0_42], %77 {strides = array<i32>} : memref<1x2x4xf32, #tpu.memory_space<vmem>>, vector<1x2x4xf32>,
      %c0_43 = arith.constant 0 : index
      %c0_44 = arith.constant 0 : index
      %c0_45 = arith.constant 0 : index
      %79 = vector.load %arg9[%c0_43, %c0_44, %c0_45] : memref<2x4x128xf32, #tpu.memory_space<vmem>>, vector<2x4x128xf32>
      %cst_46 = arith.constant dense<0.000000e+00> : vector<2x4xf32>
      %80 = vector.multi_reduction <add>, %79, %cst_46 [2] : vector<2x4x128xf32> to vector<2x4xf32>
      %81 = vector.shape_cast %80 : vector<2x4xf32> to vector<1x2x4xf32>
      %c0_47 = arith.constant 0 : index
      %c0_48 = arith.constant 0 : index
      %c0_49 = arith.constant 0 : index
      %82 = vector.load %arg6[%c0_47, %c0_48, %c0_49] : memref<1x2x4xf32, #tpu.memory_space<vmem>>, vector<1x2x4xf32>
      tpu.vector_store %arg6[%c0_47, %c0_48, %c0_49], %81 {strides = array<i32>} : memref<1x2x4xf32, #tpu.memory_space<vmem>>, vector<1x2x4xf32>,
    } else {
    }
    return
  }
  func.func @transform_0(%arg0: i32, %arg1: i32) -> (i32, i32, i32) {
    %c1_i32 = arith.constant 1 : i32
    %0 = arith.muli %arg0, %c1_i32 : i32
    %1 = arith.addi %0, %arg1 : i32
    %c0_i32 = arith.constant 0 : i32
    %2 = arith.minsi %1, %c0_i32 : i32
    %c0_i32_0 = arith.constant 0 : i32
    %c0_i32_1 = arith.constant 0 : i32
    %c0_i32_2 = arith.constant 0 : i32
    return %c0_i32_0, %c0_i32_1, %2 : i32, i32, i32
  }
  func.func @transform_1(%arg0: i32, %arg1: i32) -> (i32, i32) {
    %c1_i32 = arith.constant 1 : i32
    %0 = arith.muli %arg0, %c1_i32 : i32
    %1 = arith.addi %0, %arg1 : i32
    %c0_i32 = arith.constant 0 : i32
    %2 = arith.minsi %1, %c0_i32 : i32
    %c0_i32_0 = arith.constant 0 : i32
    %c0_i32_1 = arith.constant 0 : i32
    return %c0_i32_0, %2 : i32, i32
  }
  func.func @transform_2(%arg0: i32, %arg1: i32) -> (i32, i32, i32) {
    %c0_i32 = arith.constant 0 : i32
    %c0_i32_0 = arith.constant 0 : i32
    %c0_i32_1 = arith.constant 0 : i32
    return %arg0, %c0_i32, %c0_i32_0 : i32, i32, i32
  }
  func.func @transform_3(%arg0: i32, %arg1: i32) -> (i32, i32, i32) {
    %c0_i32 = arith.constant 0 : i32
    %c0_i32_0 = arith.constant 0 : i32
    %c0_i32_1 = arith.constant 0 : i32
    return %arg0, %c0_i32, %c0_i32_0 : i32, i32, i32
  }
  func.func @transform_4(%arg0: i32, %arg1: i32) -> (i32, i32, i32) {
    %c0_i32 = arith.constant 0 : i32
    %c0_i32_0 = arith.constant 0 : i32
    %c0_i32_1 = arith.constant 0 : i32
    return %arg0, %c0_i32, %c0_i32_0 : i32, i32, i32
  }
}

</mosaic_0001>

<bundles_post_ra>
// kernel: tpu_custom_call.1
= control target key start
LH: loop header
LB: loop body
LE: loop exit
PB: predicated region body
PF: predicated region fallthrough
CT: control target
= control target key end

     0   :  { %10 = vsyncpa [#allocation6], 0  ;;  %s1165_s0 = inlined_call_operand.hbm [shape: f32[2,4,512], index: 0, kind: input, shape index: {}]   ;;  %s1166_s1 = inlined_call_operand.hbm [shape: s32[2,512], index: 1, kind: input, shape index: {}]   ;;  %s1167_s2 = inlined_call_operand.hbm [shape: f32[1,2,4], index: 2, kind: output, shape index: {0}]   ;;  %s1168_s3 = inlined_call_operand.hbm [shape: f32[1,2,4], index: 3, kind: output, shape index: {1}]   ;;  %s1169_s4 = inlined_call_operand.hbm [shape: f32[1,2,4], index: 4, kind: output, shape index: {2}]  }
   0x1   :  { %11 = vsyncpa [#allocation9], 0 }
   0x2   :  { %12 = vsyncpa [#allocation7], 0 }
   0x3   :  { %13 = vsyncpa [#allocation12], 0  ;;  %s799_s15 = smov [#allocation5]   ;;  %s681_s19 = scalar_lea.hbm %s1165_s0, 512 }
   0x4   :  { %s25_s16 = sshll.u32 %s799_s15, 4  ;;  %p682_p0 = scmp.ne.s32.totalorder %s1165_s0, %s681_s19  ;;  %s26_s16 = int_to_ptr.vmem [resolvable:$true] %s25_s16 }
   0x5   :  { %p685_p1 = scmp.lt.u32.totalorder %s681_s19, %s1165_s0 }
   0x7   :  { %p687_p2 = pnand %p685_p1, %p682_p0 }
   0x9   :  { %690 = shalt.err (!%p687_p2)
}
   0xa   :  { %s691_s24 = scalar_lea.vmem %s26_s16, 512  ;;  %p696_p4 = scmp.lt.s32.totalorder %s26_s16, %s26_s16 }
   0xb   :  { %p692_p3 = scmp.ne.s32.totalorder %s26_s16, %s691_s24  ;;  %p697_p5 = scmp.lt.s32.totalorder %s691_s24, %s691_s24 }
   0xd   :  { %p698_p6 = por %p697_p5, %p696_p4 }
   0xf   :  { %p699_p7 = pnand %p698_p6, %p692_p3 }
  0x11   :  { %702 = shalt.err (!%p699_p7)
}
  0x12   :  { %s800_s25 = smov 256   ;;  %s801_s26 = smov 16  }
  0x13   :  { %31 = dma.hbm_to_vmem [thread:$0]  %s1165_s0, 512, %s26_s16, [#allocation6], %s800_s25, %s800_s25, %s801_s26  }
  0x14   :  { %s802_s29 = smov [#allocation8]   ;;  %s703_s7 = scalar_lea.hbm %s1166_s1, 128 }
  0x15   :  { %s44_s30 = sshll.u32 %s802_s29, 4  ;;  %p704_p8 = scmp.ne.s32.totalorder %s1166_s1, %s703_s7  ;;  %s45_s30 = int_to_ptr.vmem [resolvable:$true] %s44_s30 }
  0x16   :  { %p707_p9 = scmp.lt.u32.totalorder %s703_s7, %s1166_s1 }
  0x18   :  { %p709_p10 = pnand %p707_p9, %p704_p8 }
  0x1a   :  { %712 = shalt.err (!%p709_p10)
}
  0x1b   :  { %s713_s12 = scalar_lea.vmem %s45_s30, 128  ;;  %p718_p12 = scmp.lt.s32.totalorder %s45_s30, %s45_s30 }
  0x1c   :  { %p714_p11 = scmp.ne.s32.totalorder %s45_s30, %s713_s12  ;;  %p719_p13 = scmp.lt.s32.totalorder %s713_s12, %s713_s12 }
  0x1e   :  { %p720_p0 = por %p719_p13, %p718_p12 }
  0x20   :  { %p721_p1 = pnand %p720_p0, %p714_p11 }
  0x22   :  { %724 = shalt.err (!%p721_p1)
}
  0x23   :  { %47 = dma.hbm_to_vmem [thread:$0]  %s1166_s1, 128, %s45_s30, [#allocation9]  }
  0x24   :  { %791 = dma.done.wait [#allocation6], 512  }
  0x25   :  { %792 = vsyncadd [#allocation6], 4294966784 }
  0x26   :  { %793 = dma.done.wait [#allocation9], 128  }
  0x27   :  { %794 = vsyncadd [#allocation9], 4294967168  ;;  %v79_v0 = vlaneseq  ;;  %v803_v1 = vmov 0.0   ;;  %v804_v2 = vmov 1966171168   ;;  %v806_v9 = vmov 1  }
  0x28   :  { %68 = vst [vmem:[#allocation3] sm:$0xf] %v803_v1  ;;  %v100_v3 = vunpack.c.l.s4 %v804_v2  ;;  %66 = vst [vmem:[#allocation2] sm:$0xf] %v803_v1  ;;  %v805_v5 = vmov 1983009808   ;;  %v97_v10 = vcombine.low %v806_v9, %v806_v9 }
  0x29   :  { %67 = vst [vmem:[#allocation2 + $0x4] sm:$0xf] %v803_v1  ;;  %69 = vst [vmem:[#allocation3 + $0x4] sm:$0xf] %v803_v1  ;;  %v866_v4 = vshrl.u32 %v79_v0, 7  ;;  %v195_v6 = vunpack.c.l.s4 %v805_v5  ;;  %v80_v7 = vand.u32 127, %v79_v0 }
  0x2a   :  { %70 = vst [vmem:[#allocation4] sm:$0xf] %v803_v1  ;;  %71 = vst [vmem:[#allocation4 + $0x4] sm:$0xf] %v803_v1  ;;  %v101_v8 = vunpack.c.0.s8 %v100_v3  ;;  %v76_v14 = vld [vmem:[#allocation8] sm:$0xff]  ;;  %vm304_vm0 = vcmask 1043456  }
  0x2b   :  { %v196_v12 = vunpack.c.0.s8 %v195_v6  ;;  %v870_v13 = vsub.s32 %v80_v7, %v866_v4  ;;  %v193_v17 = vcombine.high %v76_v14, %v76_v14  ;;  %v72_v19 = vld [vmem:[#allocation5] sm:$0xff]  ;;  %v73_v20 = vld [vmem:[#allocation5 + $0x8] sm:$0xff]  ;;  %v874_v23 = vsub.s32 0, %v866_v4  ;;  %v879_v26 = vld [vmem:[#allocation5 + $0x10] sm:$0xff]  ;;  %s808_s1 = smov [#allocation11]  }
  0x2c   :  { %v104_v11 = vsub.s32 %v101_v8, %v866_v4  ;;  %v877_v24 = vsub.s32 1, %v866_v4  ;;  %v882_v27 = vsub.s32 2, %v866_v4  ;;  %v884_v30 = vld [vmem:[#allocation5 + $0x18] sm:$0xff]  ;;  %v887_v32 = vsub.s32 3, %v866_v4  ;;  %s593_s14 = sshll.u32 %s808_s1, 4  ;;  %s594_s14 = int_to_ptr.vmem [resolvable:$true] %s593_s14 }
  0x2d   :  { %v199_v15 = vsub.s32 %v196_v12, %v866_v4  ;;  %v177_v34 = vcombine.high %v72_v19, %v72_v19  ;;  %v178_v35 = vcombine.high %v73_v20, %v73_v20  ;;  %v179_v37 = vcombine.high %v879_v26, %v879_v26  ;;  %s725_s15 = scalar_lea.vmem %s594_s14, 32  ;;  %p730_p3 = scmp.lt.s32.totalorder %s594_s14, %s594_s14 }
  0x2e   :  { %v105_v16 = vrot.slane %v97_v10, %v104_v11  ;;  %v807_v39 = vmov 0   ;;  %v180_v42 = vcombine.high %v884_v30, %v884_v30  ;;  %p726_p2 = scmp.ne.s32.totalorder %s594_s14, %s725_s15  ;;  %p731_p4 = scmp.lt.s32.totalorder %s725_s15, %s725_s15 }
  0x2f   :  { %v200_v18 = vrot.slane %v76_v14, %v199_v15  ;;  %v207_v25 = vrot.slane %v193_v17, %v199_v15  ;;  %v465_v52 = vld [vmem:[#allocation2] sm:$0xf] }
  0x30   :  { %v113_v21 = vcombine.low %v105_v16, %v105_v16  ;;  %v114_v22 = vcombine.high %v105_v16, %v105_v16  ;;  %p732_p5 = por %p731_p4, %p730_p3 }
  0x31   :  { %v208_v28 = vcombine.high %v200_v18, %v200_v18  ;;  %v209_v33 = vcombine.high %v207_v25, %v207_v25  ;;  %v489_v53 = vld [vmem:[#allocation4] sm:$0xf] }
  0x32   :  { %v121_v29 = vrot.slane %v113_v21, %v104_v11  ;;  %v128_v31 = vrot.slane %v114_v22, %v104_v11  ;;  %p733_p6 = pnand %p732_p5, %p726_p2 }
  0x33   :  { %v216_v36 = vcombine.low %v200_v18, %v208_v28  ;;  %v217_v38 = vcombine.low %v207_v25, %v209_v33 }
  0x34   :  { %vm129_vm1 = vcmp.ne.s32.totalorder %v121_v29, 0  ;;  %vm130_vm2 = vcmp.ne.s32.totalorder %v128_v31, 0 }
  0x35   :  { %v131_v40 = vsel %vm129_vm1, 1, %v807_v39  ;;  %v891_v41 = vsel %vm130_vm2, 1, %v807_v39  ;;  %v224_v43 = vrot.slane %v216_v36, %v104_v11  ;;  %v231_v47 = vrot.slane %v217_v38, %v104_v11  ;;  %v478_v38 = vld [vmem:[#allocation3 + $0x4] sm:$0xf] }
  0x36   :  { %v136_v44 = vrot.slane %v131_v40, %v874_v23  ;;  %v140_v45 = vrot.slane %v131_v40, %v877_v24  ;;  %v144_v46 = vrot.slane %v131_v40, %v882_v27  ;;  %v148_v48 = vrot.slane %v131_v40, %v887_v32 }
  0x37   :  { %v152_v49 = vrot.slane %v891_v41, %v874_v23  ;;  %v156_v50 = vrot.slane %v891_v41, %v877_v24  ;;  %v160_v54 = vrot.slane %v891_v41, %v882_v27  ;;  %v232_v55 = vcombine.low %v224_v43, %v231_v47 }
  0x38   :  { %vm903_vm3 = vcmp.eq.s32.totalorder %v136_v44, 1  ;;  %vm907_vm4 = vcmp.eq.s32.totalorder %v140_v45, 1  ;;  %vm911_vm5 = vcmp.eq.s32.totalorder %v144_v46, 1  ;;  %v233_v56 = vcombine.high %v224_v43, %v231_v47 }
  0x39   :  { %vm917_vm6 = vcmp.eq.s32.totalorder %v148_v48, 1  ;;  %v923_v58 = vsel %vm903_vm3, %v72_v19, 0.0  ;;  %v927_v59 = vsel %vm907_vm4, %v177_v34, 0.0  ;;  %v931_v60 = vsel %vm911_vm5, %v73_v20, 0.0 }
  0x3a   :  { %v935_v61 = vsel %vm917_vm6, %v178_v35, 0.0  ;;  %v305_v62 = vsel %vm304_vm0, %v923_v58, -inf  ;;  %v240_v63 = vrot.slane %v232_v55, %v104_v11  ;;  %v247_v0 = vrot.slane %v233_v56, %v104_v11 }
  0x3b   :  { %v306_v2 = vrot.slane %v305_v62, 4  ;;  %v312_v3 = vsel %vm304_vm0, %v927_v59, -inf  ;;  %v319_v6 = vsel %vm304_vm0, %v931_v60, -inf  ;;  %v326_v7 = vsel %vm304_vm0, %v935_v61, -inf }
  0x3c   :  { %v313_v5 = vrot.slane %v312_v3, 4  ;;  %v164_v8 = vrot.slane %v891_v41, %v887_v32  ;;  %v251_v9 = vrot.slane %v240_v63, %v874_v23  ;;  %v255_v10 = vrot.slane %v240_v63, %v877_v24 }
  0x3d   :  { %v259_v11 = vrot.slane %v240_v63, %v882_v27  ;;  %v263_v12 = vrot.slane %v240_v63, %v887_v32  ;;  %v267_v14 = vrot.slane %v247_v0, %v874_v23  ;;  %v271_v15 = vrot.slane %v247_v0, %v877_v24  ;;  %v477_v24 = vld [vmem:[#allocation3] sm:$0xf] }
  0x3e   :  { %v275_v16 = vrot.slane %v247_v0, %v882_v27  ;;  %v279_v17 = vrot.slane %v247_v0, %v887_v32  ;;  %vm280_vm7 = vcmp.eq.s32.totalorder %v866_v4, %v251_v9  ;;  %vm281_vm8 = vcmp.eq.s32.totalorder %v866_v4, %v255_v10 }
  0x3f   :  { %vm282_vm9 = vcmp.eq.s32.totalorder %v866_v4, %v259_v11  ;;  %vm283_vm10 = vcmp.eq.s32.totalorder %v866_v4, %v263_v12  ;;  %v960_v18 = vsel %vm280_vm7, 1.0, %v803_v1  ;;  %v963_v19 = vsel %vm281_vm8, 1.0, %v803_v1 }
  0x40   :  { %v966_v20 = vsel %vm282_vm9, 1.0, %v803_v1  ;;  %v969_v21 = vsel %vm283_vm10, 1.0, %v803_v1  ;;  %vm284_vm11 = vcmp.eq.s32.totalorder %v866_v4, %v267_v14  ;;  %vm285_vm12 = vcmp.eq.s32.totalorder %v866_v4, %v271_v15 }
  0x41   :  { %v479_v22 = vadd.f32 %v966_v20, %v960_v18  ;;  %v480_v23 = vadd.f32 %v969_v21, %v963_v19  ;;  %vm286_vm13 = vcmp.eq.s32.totalorder %v866_v4, %v275_v16  ;;  %vm287_vm14 = vcmp.eq.s32.totalorder %v866_v4, %v279_v17 }
  0x42   :  { %v980_v25 = vsel %vm284_vm11, 1.0, %v803_v1  ;;  %v983_v27 = vsel %vm285_vm12, 1.0, %v803_v1  ;;  %v986_v29 = vsel %vm286_vm13, 1.0, %v803_v1  ;;  %v989_v31 = vsel %vm287_vm14, 1.0, %v803_v1 }
  0x43   :  { %v483_v28 = vadd.f32 %v480_v23, %v479_v22  ;;  %v307_v32 = vmax.f32 %v305_v62, %v306_v2  ;;  %v481_v33 = vadd.f32 %v986_v29, %v980_v25  ;;  %v482_v4 = vadd.f32 %v989_v31, %v983_v27 }
  0x44   :  { %v314_v34 = vmax.f32 %v312_v3, %v313_v5  ;;  %v320_v35 = vrot.slane %v319_v6, 4  ;;  %v327_v40 = vrot.slane %v326_v7, 4  ;;  %vm995_vm15 = vcmp.eq.s32.totalorder %v152_v49, 1 }
  0x45   :  { %v485_v36 = vadd.f32 %v483_v28, %v477_v24  ;;  %v308_v39 = vrot.slane %v307_v32, 2  ;;  %v484_v43 = vadd.f32 %v482_v4, %v481_v33  ;;  %vm999_vm1 = vcmp.eq.s32.totalorder %v156_v50, 1 }
  0x46   :  { %v315_v1 = vrot.slane %v314_v34, 2  ;;  %v321_v44 = vmax.f32 %v319_v6, %v320_v35  ;;  %v328_v47 = vmax.f32 %v326_v7, %v327_v40  ;;  %vm1003_vm2 = vcmp.eq.s32.totalorder %v160_v54, 1 }
  0x47   :  { %487 = vst [vmem:[#allocation3] sm:$0xf] %v485_v36  ;;  %v309_v46 = vmax.f32 %v307_v32, %v308_v39  ;;  %vm1007_vm7 = vcmp.eq.s32.totalorder %v164_v8, 1  ;;  %v486_v49 = vadd.f32 %v484_v43, %v478_v38  ;;  %v1014_v50 = vsel %vm995_vm15, %v879_v26, 0.0 }
  0x48   :  { %v316_v56 = vmax.f32 %v314_v34, %v315_v1  ;;  %v322_v62 = vrot.slane %v321_v44, 2  ;;  %v329_v0 = vrot.slane %v328_v47, 2  ;;  %v190_v54 = vsel %vm999_vm1, %v179_v37, 0.0 }
  0x49   :  { %v310_v63 = vrot.slane %v309_v46, 1  ;;  %v1024_v2 = vsel %vm1003_vm2, %v884_v30, 0.0  ;;  %488 = vst [vmem:[#allocation3 + $0x4] sm:$0xf] %v486_v49  ;;  %v1031_v6 = vsel %vm1007_vm7, %v180_v42, 0.0  ;;  %v333_v26 = vsel %vm304_vm0, %v1014_v50, -inf }
  0x4a   :  { %v317_v3 = vrot.slane %v316_v56, 1  ;;  %v323_v5 = vmax.f32 %v321_v44, %v322_v62  ;;  %v330_v37 = vmax.f32 %v328_v47, %v329_v0  ;;  %v334_v8 = vrot.slane %v333_v26, 4 }
  0x4b   :  { %v311_v7 = vmax.f32 %v309_v46, %v310_v63  ;;  %v340_v9 = vsel %vm304_vm0, %v190_v54, -inf  ;;  %v347_v14 = vsel %vm304_vm0, %v1024_v2, -inf  ;;  %v354_v28 = vsel %vm304_vm0, %v1031_v6, -inf }
  0x4c   :  { %v318_v10 = vmax.f32 %v316_v56, %v317_v3  ;;  %v324_v11 = vrot.slane %v323_v5, 1  ;;  %v341_v12 = vrot.slane %v340_v9, 4  ;;  %v331_v15 = vrot.slane %v330_v37, 1 }
  0x4d   :  { %v361_v30 = vsub.f32 %v923_v58, %v311_v7  ;;  %v335_v16 = vmax.f32 %v333_v26, %v334_v8  ;;  %v348_v42 = vrot.slane %v347_v14, 4  ;;  %v355_v43 = vrot.slane %v354_v28, 4 }
  0x4e   :  { %v535_v17 = vld [vmem:[#allocation3] sm:$0xf]  ;;  %v325_v22 = vmax.f32 %v323_v5, %v324_v11  ;;  %v362_v23 = vsub.f32 %v927_v59, %v318_v10  ;;  %v342_v24 = vmax.f32 %v340_v9, %v341_v12  ;;  %v332_v33 = vmax.f32 %v330_v37, %v331_v15 }
  0x4f   :  { %v537_v32 = vsel %vm304_vm0, %v535_v17, 0.0  ;;  %v369_v4 = vmul.f32 1.442695, %v361_v30  ;;  %v336_v34 = vrot.slane %v335_v16, 2  ;;  %v349_v38 = vmax.f32 %v347_v14, %v348_v42 }
  0x50   :  { %538 = vadd.xlane.f32.xlu0 %v537_v32  ;;  %v363_v35 = vsub.f32 %v931_v60, %v325_v22  ;;  %v371_v36 = vmul.f32 1.442695, %v362_v23  ;;  %v343_v58 = vrot.slane %v342_v24, 2  ;;  %v536_v39 = vld [vmem:[#allocation3 + $0x4] sm:$0xf]  ;;  %v364_v40 = vsub.f32 %v935_v61, %v332_v33 }
  0x51   :  { %649 = vpow2.f32 %v369_v4  ;;  %v337_v59 = vmax.f32 %v335_v16, %v336_v34  ;;  %v540_v1 = vsel %vm304_vm0, %v536_v39, 0.0  ;;  %v350_v56 = vrot.slane %v349_v38, 2 }
  0x52   :  { %651 = vpow2.f32 %v371_v36  ;;  %v373_v44 = vmul.f32 1.442695, %v363_v35  ;;  %v344_v46 = vmax.f32 %v342_v24, %v343_v58  ;;  %v375_v47 = vmul.f32 1.442695, %v364_v40 }
  0x53   :  { %v338_v49 = vrot.slane %v337_v59, 1  ;;  %v356_v62 = vmax.f32 %v354_v28, %v355_v43  ;;  %v351_v0 = vmax.f32 %v349_v38, %v350_v56 }
  0x54   :  { %541 = vadd.xlane.f32.xlu0 %v540_v1  ;;  %653 = vpow2.f32 %v373_v44  ;;  %v345_v60 = vrot.slane %v344_v46, 1 }
  0x55   :  { %655 = vpow2.f32 %v375_v47  ;;  %v339_v63 = vmax.f32 %v337_v59, %v338_v49  ;;  %v357_v3 = vrot.slane %v356_v62, 2  ;;  %v352_v5 = vrot.slane %v351_v0, 1 }
  0x56   :  { %v346_v61 = vmax.f32 %v344_v46, %v345_v60 }
  0x57   :  { %v358_v26 = vmax.f32 %v356_v62, %v357_v3  ;;  %v365_v7 = vsub.f32 %v1014_v50, %v339_v63  ;;  %v353_v8 = vmax.f32 %v351_v0, %v352_v5 }
  0x58   :  { %v366_v37 = vsub.f32 %v190_v54, %v346_v61 }
  0x59   :  { %v359_v9 = vrot.slane %v358_v26, 1  ;;  %v377_v10 = vmul.f32 1.442695, %v365_v7  ;;  %v367_v15 = vsub.f32 %v1024_v2, %v353_v8 }
  0x5a   :  { %v379_v11 = vmul.f32 1.442695, %v366_v37 }
  0x5b   :  { %v1047_v12 = vpop.eup %649  ;;  %v360_v14 = vmax.f32 %v358_v26, %v359_v9  ;;  %657 = vpow2.f32 %v377_v10  ;;  %v381_v17 = vmul.f32 1.442695, %v367_v15 }
  0x5c   :  { %v1050_v30 = vpop.eup %651  ;;  %v385_v16 = vsel %vm304_vm0, %v1047_v12, 0.0  ;;  %659 = vpow2.f32 %v379_v11 }
  0x5d   :  { %v386_v42 = vrot.slane %v385_v16, 4  ;;  %v392_v50 = vsel %vm304_vm0, %v1050_v30, 0.0  ;;  %v368_v54 = vsub.f32 %v1031_v6, %v360_v14  ;;  %661 = vpow2.f32 %v381_v17 }
  0x5e   :  { %v1057_v22 = vpop.eup %653  ;;  %v393_v23 = vrot.slane %v392_v50, 4 }
  0x5f   :  { %v1059_v24 = vpop.eup %655  ;;  %v387_v2 = vadd.f32 %v386_v42, %v385_v16  ;;  %v399_v28 = vsel %vm304_vm0, %v1057_v22, 0.0  ;;  %v383_v32 = vmul.f32 1.442695, %v368_v54 }
  0x60   :  { %v394_v33 = vadd.f32 %v393_v23, %v392_v50  ;;  %v400_v4 = vrot.slane %v399_v28, 4  ;;  %v406_v34 = vsel %vm304_vm0, %v1059_v24, 0.0 }
  0x61   :  { %v388_v35 = vrot.slane %v387_v2, 2  ;;  %v407_v36 = vrot.slane %v406_v34, 4  ;;  %663 = vpow2.f32 %v383_v32 }
  0x62   :  { %v395_v6 = vrot.slane %v394_v33, 2  ;;  %v401_v58 = vadd.f32 %v400_v4, %v399_v28 }
  0x63   :  { %v389_v38 = vadd.f32 %v388_v35, %v387_v2  ;;  %v408_v39 = vadd.f32 %v407_v36, %v406_v34 }
  0x64   :  { %v396_v40 = vadd.f32 %v395_v6, %v394_v33  ;;  %v402_v59 = vrot.slane %v401_v58, 2 }
  0x65   :  { %v1065_v43 = vpop.eup %657  ;;  %v390_v1 = vrot.slane %v389_v38, 1  ;;  %v409_v44 = vrot.slane %v408_v39, 2 }
  0x66   :  { %v1067_v46 = vpop.eup %659  ;;  %v397_v47 = vrot.slane %v396_v40, 1  ;;  %v403_v49 = vadd.f32 %v402_v59, %v401_v58  ;;  %v413_v56 = vsel %vm304_vm0, %v1065_v43, 0.0 }
  0x67   :  { %v391_v62 = vadd.f32 %v390_v1, %v389_v38  ;;  %v410_v60 = vadd.f32 %v409_v44, %v408_v39  ;;  %v414_v63 = vrot.slane %v413_v56, 4  ;;  %v420_v0 = vsel %vm304_vm0, %v1067_v46, 0.0  ;;  %v1073_v26 = vpop.eup %661 }
  0x68   :  { %v398_v3 = vadd.f32 %v397_v47, %v396_v40  ;;  %v404_v61 = vrot.slane %v403_v49, 1  ;;  %v421_v5 = vrot.slane %v420_v0, 4  ;;  %v427_v10 = vsel %vm304_vm0, %v1073_v26, 0.0 }
  0x69   :  { %v411_v7 = vrot.slane %v410_v60, 1  ;;  %665 = vrcp.f32 %v391_v62  ;;  %v415_v37 = vadd.f32 %v414_v63, %v413_v56  ;;  %v428_v16 = vrot.slane %v427_v10, 4 }
  0x6a   :  { %v405_v8 = vadd.f32 %v404_v61, %v403_v49  ;;  %667 = vrcp.f32 %v398_v3  ;;  %v422_v9 = vadd.f32 %v421_v5, %v420_v0 }
  0x6b   :  { %v1077_v11 = vpop.eup %663  ;;  %v412_v14 = vadd.f32 %v411_v7, %v410_v60  ;;  %v416_v15 = vrot.slane %v415_v37, 2  ;;  %v429_v17 = vadd.f32 %v428_v16, %v427_v10 }
  0x6c   :  { %669 = vrcp.f32 %v405_v8  ;;  %v423_v42 = vrot.slane %v422_v9, 2  ;;  %v434_v50 = vsel %vm304_vm0, %v1077_v11, 0.0 }
  0x6d   :  { %671 = vrcp.f32 %v412_v14  ;;  %v417_v54 = vadd.f32 %v416_v15, %v415_v37  ;;  %v435_v23 = vrot.slane %v434_v50, 4  ;;  %v430_v32 = vrot.slane %v429_v17, 2 }
  0x6e   :  { %v424_v2 = vadd.f32 %v423_v42, %v422_v9 }
  0x6f   :  { %v418_v28 = vrot.slane %v417_v54, 1  ;;  %v436_v33 = vadd.f32 %v435_v23, %v434_v50  ;;  %v431_v35 = vadd.f32 %v430_v32, %v429_v17 }
  0x70   :  { %v425_v4 = vrot.slane %v424_v2, 1 }
  0x71   :  { %v419_v34 = vadd.f32 %v418_v28, %v417_v54  ;;  %v437_v36 = vrot.slane %v436_v33, 2  ;;  %v432_v38 = vrot.slane %v431_v35, 1 }
  0x72   :  { %v426_v6 = vadd.f32 %v425_v4, %v424_v2 }
  0x73   :  { %v666_v58 = vpop.eup %665  ;;  %v438_v39 = vadd.f32 %v437_v36, %v436_v33  ;;  %673 = vrcp.f32 %v419_v34  ;;  %v433_v44 = vadd.f32 %v432_v38, %v431_v35  ;;  %v466_v33 = vld [vmem:[#allocation2 + $0x4] sm:$0xf]  ;;  %v490_v35 = vld [vmem:[#allocation4 + $0x4] sm:$0xf] }
  0x74   :  { %v668_v40 = vpop.eup %667  ;;  %v449_v59 = vmul.f32 %v666_v58, %v1047_v12  ;;  %675 = vrcp.f32 %v426_v6 }
  0x75   :  { %v450_v1 = vmul.f32 %v668_v40, %v1050_v30  ;;  %v439_v47 = vrot.slane %v438_v39, 1  ;;  %677 = vrcp.f32 %v433_v44 }
  0x76   :  { %v670_v49 = vpop.eup %669  ;;  %v457_v60 = vsel %vm903_vm3, %v449_v59, 0.0  ;;  %vm530_vm3 = vcmask 1041409  }
  0x77   :  { %v672_v56 = vpop.eup %671  ;;  %v451_v62 = vmul.f32 %v670_v49, %v1057_v22  ;;  %v440_v63 = vadd.f32 %v439_v47, %v438_v39  ;;  %v458_v3 = vsel %vm907_vm4, %v450_v1, 0.0  ;;  %v491_v12 = vmul.f32 %v960_v18, %v457_v60 }
  0x78   :  { %v452_v0 = vmul.f32 %v672_v56, %v1059_v24  ;;  %v492_v61 = vmul.f32 %v963_v19, %v458_v3  ;;  %vm533_vm4 = vcmask 25600  }
  0x79   :  { %v459_v30 = vsel %vm911_vm5, %v451_v62, 0.0  ;;  %679 = vrcp.f32 %v440_v63 }
  0x7a   :  { %v460_v22 = vsel %vm917_vm6, %v452_v0, 0.0  ;;  %v467_v51 = vadd.f32 %v459_v30, %v457_v60  ;;  %v493_v5 = vmul.f32 %v966_v20, %v459_v30 }
  0x7b   :  { %v468_v7 = vadd.f32 %v460_v22, %v458_v3  ;;  %v494_v24 = vmul.f32 %v969_v21, %v460_v22 }
  0x7c   :  { %v499_v37 = vadd.f32 %v493_v5, %v491_v12 }
  0x7d   :  { %v674_v8 = vpop.eup %673  ;;  %v471_v18 = vadd.f32 %v468_v7, %v467_v51  ;;  %v500_v9 = vadd.f32 %v494_v24, %v492_v61 }
  0x7e   :  { %v676_v10 = vpop.eup %675  ;;  %v453_v19 = vmul.f32 %v674_v8, %v1065_v43 }
  0x7f   :  { %v473_v14 = vadd.f32 %v471_v18, %v465_v52  ;;  %v503_v15 = vadd.f32 %v500_v9, %v499_v37  ;;  %v454_v57 = vmul.f32 %v676_v10, %v1067_v46  ;;  %v678_v42 = vpop.eup %677 }
  0x80   :  { %v455_v50 = vmul.f32 %v678_v42, %v1073_v26  ;;  %v461_v21 = vsel %vm995_vm15, %v453_v19, 0.0 }
  0x81   :  { %475 = vst [vmem:[#allocation2] sm:$0xf] %v473_v14  ;;  %v505_v16 = vadd.f32 %v503_v15, %v489_v53  ;;  %v462_v17 = vsel %vm999_vm1, %v454_v57, 0.0  ;;  %v495_v43 = vmul.f32 %v980_v25, %v461_v21 }
  0x82   :  { %v463_v46 = vsel %vm1003_vm2, %v455_v50, 0.0  ;;  %v496_v23 = vmul.f32 %v983_v27, %v462_v17 }
  0x83   :  { %v680_v20 = vpop.eup %679  ;;  %507 = vst [vmem:[#allocation4] sm:$0xf] %v505_v16  ;;  %v469_v26 = vadd.f32 %v463_v46, %v461_v21  ;;  %v497_v41 = vmul.f32 %v986_v29, %v463_v46 }
  0x84   :  { %v456_v54 = vmul.f32 %v680_v20, %v1077_v11 }
  0x85   :  { %v501_v45 = vadd.f32 %v497_v41, %v495_v43 }
  0x86   :  { %v464_v2 = vsel %vm1007_vm7, %v456_v54, 0.0 }
  0x87   :  { %v470_v28 = vadd.f32 %v464_v2, %v462_v17  ;;  %v498_v32 = vmul.f32 %v989_v31, %v464_v2 }
  0x88   :  { %v512_v11 = vld [vmem:[#allocation2] sm:$0xf] }
  0x89   :  { %v514_v4 = vsel %vm304_vm0, %v512_v11, 0.0  ;;  %v472_v25 = vadd.f32 %v470_v28, %v469_v26  ;;  %v502_v34 = vadd.f32 %v498_v32, %v496_v23 }
  0x8a   :  { %515 = vadd.xlane.f32.xlu1 %v514_v4  ;;  %v556_v48 = vld [vmem:[#allocation4] sm:$0xf] }
  0x8b   :  { %v474_v27 = vadd.f32 %v472_v25, %v466_v33  ;;  %v558_v55 = vsel %vm304_vm0, %v556_v48, 0.0  ;;  %v504_v36 = vadd.f32 %v502_v34, %v501_v45 }
  0x8c   :  { %559 = vadd.xlane.f32.xlu0 %v558_v55 }
  0x8d   :  { %476 = vst [vmem:[#allocation2 + $0x4] sm:$0xf] %v474_v27  ;;  %v506_v29 = vadd.f32 %v504_v36, %v490_v35 }
  0x8f   :  { %508 = vst [vmem:[#allocation4 + $0x4] sm:$0xf] %v506_v29 }
  0x94   :  { %v513_v6 = vld [vmem:[#allocation2 + $0x4] sm:$0xf] }
  0x95   :  { %v517_v31 = vsel %vm304_vm0, %v513_v6, 0.0 }
  0x96   :  { %518 = vadd.xlane.f32.xlu1 %v517_v31  ;;  %v557_v58 = vld [vmem:[#allocation4 + $0x4] sm:$0xf] }
  0x97   :  { %v561_v38 = vsel %vm304_vm0, %v557_v58, 0.0 }
  0x9a   :  { %562 = vadd.xlane.f32.xlu1 %v561_v38 }
  0xdd   :  { %v539_v39 = vpop.xlane.xlu0 %538 }
  0xde   :  { %v548_v40 = vrot.slane %v539_v39, %v870_v13 }
  0xe1   :  { %v542_v59 = vpop.xlane.xlu0 %541 }
  0xe2   :  { %v552_v1 = vrot.slane %v542_v59, %v870_v13 }
  0xe4   :  { %v553_v44 = vsel %vm530_vm3, %v552_v1, %v548_v40 }
  0xe5   :  { %555 = vst.msk [vmem:[#allocation11] sm:$0x3] %vm533_vm4, %v553_v44 }
  0xe6   :  { %736 = shalt.err (!%p733_p6)
}
  0xe7   :  { %s737_s18 = scalar_lea.hbm %s1168_s3, 32 }
  0xe8   :  { %p738_p7 = scmp.ne.s32.totalorder %s1168_s3, %s737_s18  ;;  %p741_p8 = scmp.lt.u32.totalorder %s737_s18, %s1168_s3 }
  0xea   :  { %p743_p9 = pnand %p741_p8, %p738_p7 }
  0xec   :  { %746 = shalt.err (!%p743_p9)
}
  0xed   :  { %596 = dma.vmem_to_hbm [thread:$0]  %s594_s14, 32, %s1168_s3, [#allocation12]  }
  0xee   :  { %s809_s25 = smov [#allocation10]   ;;  %s810_s27 = smov [#allocation13]  }
  0xef   :  { %s583_s26 = sshll.u32 %s809_s25, 4  ;;  %s603_s28 = sshll.u32 %s810_s27, 4  ;;  %s584_s26 = int_to_ptr.vmem [resolvable:$true] %s583_s26  ;;  %s604_s28 = int_to_ptr.vmem [resolvable:$true] %s603_s28 }
  0xf0   :  { %s747_s3 = scalar_lea.vmem %s584_s26, 32  ;;  %p752_p11 = scmp.lt.s32.totalorder %s584_s26, %s584_s26 }
  0xf1   :  { %p748_p10 = scmp.ne.s32.totalorder %s584_s26, %s747_s3  ;;  %p753_p12 = scmp.lt.s32.totalorder %s747_s3, %s747_s3 }
  0xf3   :  { %p754_p13 = por %p753_p12, %p752_p11 }
  0xf5   :  { %p755_p0 = pnand %p754_p13, %p748_p10 }
 0x117   :  { %v516_v47 = vpop.xlane.xlu1 %515 }
 0x118   :  { %v525_v62 = vrot.slane %v516_v47, %v870_v13 }
 0x119   :  { %v560_v56 = vpop.xlane.xlu0 %559 }
 0x11a   :  { %v569_v63 = vrot.slane %v560_v56, %v870_v13 }
 0x123   :  { %v519_v49 = vpop.xlane.xlu1 %518 }
 0x124   :  { %v529_v60 = vrot.slane %v519_v49, %v870_v13 }
 0x126   :  { %v531_v0 = vsel %vm530_vm3, %v529_v60, %v525_v62 }
 0x127   :  { %v563_v3 = vpop.xlane.xlu1 %562  ;;  %534 = vst.msk [vmem:[#allocation10] sm:$0x3] %vm533_vm4, %v531_v0 }
 0x128   :  { %v573_v12 = vrot.slane %v563_v3, %v870_v13 }
 0x129   :  { %758 = shalt.err (!%p755_p0)
}
 0x12a   :  { %s759_s5 = scalar_lea.hbm %s1167_s2, 32 }
 0x12b   :  { %p760_p1 = scmp.ne.s32.totalorder %s1167_s2, %s759_s5  ;;  %p763_p2 = scmp.lt.u32.totalorder %s759_s5, %s1167_s2 }
 0x12d   :  { %p765_p3 = pnand %p763_p2, %p760_p1 }
 0x12f   :  { %768 = shalt.err (!%p765_p3)
}
 0x130   :  { %586 = dma.vmem_to_hbm [thread:$0]  %s584_s26, 32, %s1167_s2, [#allocation7]   ;;  %v574_v13 = vsel %vm530_vm3, %v573_v12, %v569_v63 }
 0x131   :  { %576 = vst.msk [vmem:[#allocation13] sm:$0x3] %vm533_vm4, %v574_v13  ;;  %s769_s12 = scalar_lea.vmem %s604_s28, 32  ;;  %p774_p5 = scmp.lt.s32.totalorder %s604_s28, %s604_s28 }
 0x132   :  { %p770_p4 = scmp.ne.s32.totalorder %s604_s28, %s769_s12  ;;  %p775_p6 = scmp.lt.s32.totalorder %s769_s12, %s769_s12 }
 0x134   :  { %p776_p7 = por %p775_p6, %p774_p5 }
 0x136   :  { %p777_p8 = pnand %p776_p7, %p770_p4 }
 0x138   :  { %780 = shalt.err (!%p777_p8)
}
 0x139   :  { %s781_s1 = scalar_lea.hbm %s1169_s4, 32 }
 0x13a   :  { %p782_p9 = scmp.ne.s32.totalorder %s1169_s4, %s781_s1  ;;  %p785_p10 = scmp.lt.u32.totalorder %s781_s1, %s1169_s4 }
 0x13c   :  { %p787_p11 = pnand %p785_p10, %p782_p9 }
 0x13e   :  { %790 = shalt.err (!%p787_p11)
}
 0x13f   :  { %606 = dma.vmem_to_hbm [thread:$0]  %s604_s28, 32, %s1169_s4, [#allocation12]  }
 0x140   :  { %795 = dma.done.wait [#allocation7], 32  }
 0x141   :  { %796 = vsyncadd [#allocation7], 4294967264 }
 0x142   :  { %797 = dma.done.wait [#allocation12], 64  }
 0x143   :  { %798 = vsyncadd [#allocation12], 4294967232 }
 0x144   :  { %616 = vsyncpa [#allocation6], 1 }
 0x145   :  { %617 = vsyncpa [#allocation9], 1 }
 0x146   :  { %618 = vsyncpa [#allocation7], 1 }
 0x147   :  { %619 = vsyncpa [#allocation12], 1 }

</bundles_post_ra>
